<compile_context>
chip_gen: v7x
topology: tpu7x:2x2x1
jax: 0.10.0
libtpu: 0.0.40
codegen_flags: <defaults>
</compile_context>

<pallas_src>
import jax
import jax.numpy as jnp
from jax import lax
from jax.experimental import pallas as pl
from jax.experimental.pallas import tpu as pltpu


def _fused_layer_kernel(q_ref, c_ref, wqT_ref, wcT_ref, vec_ref,
                        outq_ref, outc_ref):
    # q_ref: (bb, Lq, D), c_ref: (bb, Lc, D)
    # wqT_ref / wcT_ref: (D, D), pre-transposed to [in, out]
    # vec_ref: (8, D) packed rows: [bq, g1, beta1, bc, g2, beta2, pad, pad]
    q = q_ref[...]
    c = c_ref[...]
    mxu_dtype = wqT_ref.dtype            # wrapper casts weights to the MXU dtype

    qm = q.astype(mxu_dtype)
    cm = c.astype(mxu_dtype)
    q32 = q.astype(jnp.float32)
    c32 = c.astype(jnp.float32)
    vec = vec_ref[...].astype(jnp.float32)

    def branch(x32, xm, ctxm, wT_ref, b, g, beta, out_ref):
        # scores = x @ ctx^T per batch -> (bb, Lx, Lctx); MXU-native dtype in,
        # f32 accumulation out.
        s = lax.dot_general(xm, ctxm, (((2,), (2,)), ((0,), (0,))),
                            preferred_element_type=jnp.float32)
        # numerically-stable softmax over the last dim (exact divide).
        s = s - jnp.max(s, axis=-1, keepdims=True)
        e = jnp.exp(s)
        attn = (e / jnp.sum(e, axis=-1, keepdims=True)).astype(mxu_dtype)

        # attended mix: attn @ ctx -> (bb, Lx, D)
        mix = lax.dot_general(attn, ctxm, (((2,), (1,)), ((0,), (0,))),
                              preferred_element_type=jnp.float32)

        # nn.Linear: mix @ W^T + b, with W already transposed to [in, out]
        # so we contract the RHS major dim (no in-kernel transpose).
        lin = lax.dot_general(mix.astype(mxu_dtype), wT_ref[...],
                              (((2,), (0,)), ((), ())),
                              preferred_element_type=jnp.float32)

        # residual + LayerNorm(eps=1e-12), one-pass mean/var form.
        y = lin + b + x32
        mu = jnp.mean(y, axis=-1, keepdims=True)
        mu2 = jnp.mean(y * y, axis=-1, keepdims=True)
        var = jnp.maximum(mu2 - mu * mu, 0.0)
        yhat = (y - mu) * lax.rsqrt(var + 1e-12)
        out_ref[...] = (yhat * g + beta).astype(out_ref.dtype)

    # q-branch: attend context with query; residual against query.
    branch(q32, qm, cm, wqT_ref, vec[0:1], vec[1:2], vec[2:3], outq_ref)
    # c-branch: attend query with context; residual against context.
    branch(c32, cm, qm, wcT_ref, vec[3:4], vec[4:5], vec[5:6], outc_ref)


def _tensorcores_per_chip():
    """Best-effort query of TensorCores per chip; defaults to 1 (v5e/v6e)."""
    try:
        info = pltpu.get_tpu_info()
    except Exception:
        return 1
    for attr in ("num_cores", "core_count", "num_tensorcores",
                 "tensorcores_per_chip"):
        v = getattr(info, attr, None)
        if isinstance(v, int) and v >= 1:
            return v
    return 1


def cross_attention_layer(query, context, params, *,
                          mxu_dtype=jnp.bfloat16, grid_b=None):
    """Full CrossAttentionLayer.forward fused into a single pallas_call.

    result_q = norm1(linear_q(att_q(query, context)) + query)
    result_c = norm2(linear_c(att_c(context, query)) + context)

    mxu_dtype: dtype fed to the MXU (accumulation is always f32).  Default
      bf16 (fast path on v5e/v6e/v7x).  Pass jnp.float32 for exact parity
      with the f32 PyTorch forward, or None to use the input dtype.
    """
    B, Lq, D = query.shape
    Lc = context.shape[1]
    if mxu_dtype is None:
        mxu_dtype = query.dtype

    # Single grid step on single-TC chips (grid is a serial loop there);
    # split the batch across grid steps only when the chip has >1 TensorCore
    # (v7x) and B divides evenly.
    if grid_b is None:
        cores = _tensorcores_per_chip()
        grid_b = cores if (cores > 1 and B % cores == 0) else 1
    bb = B // grid_b

    # One-time host-side transpose: pass weights as [in, out].
    wqT = params["Wq"].T.astype(mxu_dtype)
    wcT = params["Wc"].T.astype(mxu_dtype)

    # Pack the six per-feature vectors into one (8, D) slab -> single DMA.
    zeros = jnp.zeros((D,), jnp.float32)
    vecs = jnp.stack([params["bq"], params["g1"], params["beta1"],
                      params["bc"], params["g2"], params["beta2"],
                      zeros, zeros]).astype(jnp.float32)

    def batched(L):
        return pl.BlockSpec((bb, L, D), lambda i: (i, 0, 0))

    def shared(shape):
        return pl.BlockSpec(shape, lambda i: (0,) * len(shape))

    out_q, out_c = pl.pallas_call(
        _fused_layer_kernel,
        out_shape=(jax.ShapeDtypeStruct((B, Lq, D), query.dtype),
                   jax.ShapeDtypeStruct((B, Lc, D), context.dtype)),
        grid_spec=pltpu.PrefetchScalarGridSpec(
            num_scalar_prefetch=0,
            grid=(grid_b,),
            in_specs=[
                batched(Lq),        # query
                batched(Lc),        # context
                shared((D, D)),     # Wq^T  [in, out]
                shared((D, D)),     # Wc^T  [in, out]
                shared((8, D)),     # packed bq/g1/beta1/bc/g2/beta2 (+pad)
            ],
            out_specs=[batched(Lq), batched(Lc)],
        ),
        compiler_params=pltpu.CompilerParams(
            dimension_semantics=("parallel",)),
    )(query, context, wqT, wcT, vecs)
    return out_q, out_c


def _reference(query, context, params, mxu_dtype=None):
    """Pure-JAX reference mirroring the PyTorch forward.

    If mxu_dtype is given, the matmul inputs are cast to it (f32 accumulation),
    mirroring the kernel's fast path exactly.
    """
    def cast(x):
        return x if mxu_dtype is None else x.astype(mxu_dtype)

    def branch(q, c, W, b, g, beta):
        scores = jnp.einsum("bqd,bkd->bqk", cast(q), cast(c),
                            preferred_element_type=jnp.float32,
                            precision=lax.Precision.HIGHEST)
        attn = jax.nn.softmax(scores, axis=-1)
        mix = jnp.einsum("bqk,bkd->bqd", cast(attn), cast(c),
                         preferred_element_type=jnp.float32,
                         precision=lax.Precision.HIGHEST)
        lin = jnp.einsum("bqd,ed->bqe", cast(mix), cast(W),
                         preferred_element_type=jnp.float32,
                         precision=lax.Precision.HIGHEST) + b
        y = lin + q
        mu = jnp.mean(y, axis=-1, keepdims=True)
        var = jnp.mean((y - mu) ** 2, axis=-1, keepdims=True)
        return (y - mu) / jnp.sqrt(var + 1e-12) * g + beta

    rq = branch(query, context, params["Wq"], params["bq"],
                params["g1"], params["beta1"])
    rc = branch(context, query, params["Wc"], params["bc"],
                params["g2"], params["beta2"])
    return rq, rc


if __name__ == "__main__":
    # D=128 keeps the last dim lane-dense (full vregs, unmasked stores).
    B, Lq, Lc, D = 2, 8, 16, 128
    key = jax.random.PRNGKey(0)
    kq, kc, kwq, kbq, kwc, kbc = jax.random.split(key, 6)

    query = jax.random.normal(kq, (B, Lq, D), dtype=jnp.float32)
    context = jax.random.normal(kc, (B, Lc, D), dtype=jnp.float32)

    # AttentionWide.linear_out / tanh are defined in __init__ but never used in
    # forward, so they contribute no parameters here.
    params = {
        "Wq": jax.random.normal(kwq, (D, D), dtype=jnp.float32) * (D ** -0.5),
        "bq": jax.random.normal(kbq, (D,), dtype=jnp.float32) * 0.01,
        "g1": jnp.ones((D,), dtype=jnp.float32),
        "beta1": jnp.zeros((D,), dtype=jnp.float32),
        "Wc": jax.random.normal(kwc, (D, D), dtype=jnp.float32) * (D ** -0.5),
        "bc": jax.random.normal(kbc, (D,), dtype=jnp.float32) * 0.01,
        "g2": jnp.ones((D,), dtype=jnp.float32),
        "beta2": jnp.zeros((D,), dtype=jnp.float32),
    }

    # Fast path (default): bf16-fed MXU, f32 accumulation.  Compared against a
    # reference performing the identical casts.
    rq_fast, rc_fast = cross_attention_layer(query, context, params)
    jax.block_until_ready((rq_fast, rc_fast))
    ref_q_fast, ref_c_fast = _reference(query, context, params,
                                        mxu_dtype=jnp.bfloat16)
    assert rq_fast.shape == (B, Lq, D) and rc_fast.shape == (B, Lc, D)
    assert jnp.allclose(rq_fast, ref_q_fast, atol=2e-2, rtol=2e-2)
    assert jnp.allclose(rc_fast, ref_c_fast, atol=2e-2, rtol=2e-2)

    # Exact-parity path: f32 end-to-end, checked tightly against the f32
    # reference (mirrors the PyTorch forward numerics).
    rq_f32, rc_f32 = cross_attention_layer(query, context, params,
                                           mxu_dtype=jnp.float32)
    jax.block_until_ready((rq_f32, rc_f32))
    ref_q, ref_c = _reference(query, context, params)
    assert jnp.allclose(rq_f32, ref_q, atol=2e-3, rtol=2e-3)
    assert jnp.allclose(rc_f32, ref_c, atol=2e-3, rtol=2e-3)

    print("KERNEL_OK")
</pallas_src>

<mosaic_0001>
module attributes {stable_mosaic.version = 11 : i64} {
  func.func @_fused_layer_kernel(%arg0: i32, %arg1: memref<2x8x128xf32, #tpu.memory_space<vmem>>, %arg2: memref<2x16x128xf32, #tpu.memory_space<vmem>>, %arg3: memref<128x128xbf16, #tpu.memory_space<vmem>>, %arg4: memref<128x128xbf16, #tpu.memory_space<vmem>>, %arg5: memref<8x128xf32, #tpu.memory_space<vmem>>, %arg6: memref<2x8x128xf32, #tpu.memory_space<vmem>>, %arg7: memref<2x16x128xf32, #tpu.memory_space<vmem>>) attributes {dimension_semantics = [#tpu.dimension_semantics<parallel>], iteration_bounds = array<i64: 1>, scalar_prefetch = 0 : i64, scratch_operands = 0 : i64, tpu.core_type = #tpu.core_type<tc>, window_params = [{transform_indices = @transform_0, window_bounds = array<i64: 2, 8, 128>}, {transform_indices = @transform_1, window_bounds = array<i64: 2, 16, 128>}, {pipeline_mode = #tpu.pipeline_mode<synchronous>, transform_indices = @transform_2, window_bounds = array<i64: 128, 128>}, {pipeline_mode = #tpu.pipeline_mode<synchronous>, transform_indices = @transform_3, window_bounds = array<i64: 128, 128>}, {pipeline_mode = #tpu.pipeline_mode<synchronous>, transform_indices = @transform_4, window_bounds = array<i64: 8, 128>}, {transform_indices = @transform_5, window_bounds = array<i64: 2, 8, 128>}, {transform_indices = @transform_6, window_bounds = array<i64: 2, 16, 128>}]} {
    %c0 = arith.constant 0 : index
    %c0_0 = arith.constant 0 : index
    %c0_1 = arith.constant 0 : index
    %0 = vector.load %arg1[%c0, %c0_0, %c0_1] : memref<2x8x128xf32, #tpu.memory_space<vmem>>, vector<2x8x128xf32>
    %c0_2 = arith.constant 0 : index
    %c0_3 = arith.constant 0 : index
    %c0_4 = arith.constant 0 : index
    %1 = vector.load %arg2[%c0_2, %c0_3, %c0_4] : memref<2x16x128xf32, #tpu.memory_space<vmem>>, vector<2x16x128xf32>
    %2 = arith.truncf %0 : vector<2x8x128xf32> to vector<2x8x128xbf16>
    %3 = arith.truncf %1 : vector<2x16x128xf32> to vector<2x16x128xbf16>
    %c0_5 = arith.constant 0 : index
    %c0_6 = arith.constant 0 : index
    %4 = vector.load %arg5[%c0_5, %c0_6] : memref<8x128xf32, #tpu.memory_space<vmem>>, vector<8x128xf32>
    %5 = vector.extract_strided_slice %4 {offsets = [0, 0], sizes = [1, 128], strides = [1, 1]} : vector<8x128xf32> to vector<1x128xf32>
    %6 = vector.extract_strided_slice %4 {offsets = [1, 0], sizes = [1, 128], strides = [1, 1]} : vector<8x128xf32> to vector<1x128xf32>
    %7 = vector.extract_strided_slice %4 {offsets = [2, 0], sizes = [1, 128], strides = [1, 1]} : vector<8x128xf32> to vector<1x128xf32>
    %cst = arith.constant dense<0.000000e+00> : vector<2x8x16xf32>
    %8 = tpu.matmul %2, %3, %cst {dimension_numbers = #tpu.dot_dimension_numbers<[2], [2], [1], [1], [0, 0, 0, 1, 1, 1], [0], [0]>} : vector<2x8x128xbf16>, vector<2x16x128xbf16>, vector<2x8x16xf32> -> vector<2x8x16xf32>
    %cst_7 = arith.constant dense<0xFF800000> : vector<2x8xf32>
    %9 = vector.multi_reduction <maximumf>, %8, %cst_7 [2] : vector<2x8x16xf32> to vector<2x8xf32>
    %10 = vector.shape_cast %9 : vector<2x8xf32> to vector<2x8x1xf32>
    %11 = vector.broadcast %10 : vector<2x8x1xf32> to vector<2x8x16xf32>
    %12 = arith.subf %8, %11 : vector<2x8x16xf32>
    %13 = math.exp %12 : vector<2x8x16xf32>
    %cst_8 = arith.constant dense<0.000000e+00> : vector<2x8xf32>
    %14 = vector.multi_reduction <add>, %13, %cst_8 [2] : vector<2x8x16xf32> to vector<2x8xf32>
    %15 = vector.shape_cast %14 : vector<2x8xf32> to vector<2x8x1xf32>
    %16 = vector.broadcast %15 : vector<2x8x1xf32> to vector<2x8x16xf32>
    %17 = arith.divf %13, %16 : vector<2x8x16xf32>
    %18 = arith.truncf %17 : vector<2x8x16xf32> to vector<2x8x16xbf16>
    %cst_9 = arith.constant dense<0.000000e+00> : vector<2x8x128xf32>
    %19 = tpu.matmul %18, %3, %cst_9 {dimension_numbers = #tpu.dot_dimension_numbers<[2], [1], [1], [2], [0, 0, 0, 1, 1, 2], [0], [0]>} : vector<2x8x16xbf16>, vector<2x16x128xbf16>, vector<2x8x128xf32> -> vector<2x8x128xf32>
    %20 = arith.truncf %19 : vector<2x8x128xf32> to vector<2x8x128xbf16>
    %c0_10 = arith.constant 0 : index
    %c0_11 = arith.constant 0 : index
    %21 = vector.load %arg3[%c0_10, %c0_11] : memref<128x128xbf16, #tpu.memory_space<vmem>>, vector<128x128xbf16>
    %cst_12 = arith.constant dense<0.000000e+00> : vector<2x8x128xf32>
    %22 = tpu.matmul %20, %21, %cst_12 {dimension_numbers = #tpu.dot_dimension_numbers<[2], [0], [0, 1], [1], [0, 0, 0, 1, 1, 1], [], []>} : vector<2x8x128xbf16>, vector<128x128xbf16>, vector<2x8x128xf32> -> vector<2x8x128xf32>
    %23 = vector.shape_cast %5 : vector<1x128xf32> to vector<1x1x128xf32>
    %24 = vector.broadcast %23 : vector<1x1x128xf32> to vector<2x8x128xf32>
    %25 = arith.addf %22, %24 : vector<2x8x128xf32>
    %26 = arith.addf %25, %0 : vector<2x8x128xf32>
    %cst_13 = arith.constant dense<0.000000e+00> : vector<2x8xf32>
    %27 = vector.multi_reduction <add>, %26, %cst_13 [2] : vector<2x8x128xf32> to vector<2x8xf32>
    %28 = vector.shape_cast %27 : vector<2x8xf32> to vector<2x8x1xf32>
    %cst_14 = arith.constant 1.280000e+02 : f32
    %29 = vector.broadcast %cst_14 : f32 to vector<2x8x1xf32>
    %30 = arith.divf %28, %29 : vector<2x8x1xf32>
    %31 = arith.mulf %26, %26 : vector<2x8x128xf32>
    %cst_15 = arith.constant dense<0.000000e+00> : vector<2x8xf32>
    %32 = vector.multi_reduction <add>, %31, %cst_15 [2] : vector<2x8x128xf32> to vector<2x8xf32>
    %33 = vector.shape_cast %32 : vector<2x8xf32> to vector<2x8x1xf32>
    %cst_16 = arith.constant 1.280000e+02 : f32
    %34 = vector.broadcast %cst_16 : f32 to vector<2x8x1xf32>
    %35 = arith.divf %33, %34 : vector<2x8x1xf32>
    %36 = arith.mulf %30, %30 : vector<2x8x1xf32>
    %37 = arith.subf %35, %36 : vector<2x8x1xf32>
    %cst_17 = arith.constant 0.000000e+00 : f32
    %38 = vector.broadcast %cst_17 : f32 to vector<2x8x1xf32>
    %39 = arith.maximumf %37, %38 : vector<2x8x1xf32>
    %40 = vector.broadcast %30 : vector<2x8x1xf32> to vector<2x8x128xf32>
    %41 = arith.subf %26, %40 : vector<2x8x128xf32>
    %cst_18 = arith.constant 9.99999996E-13 : f32
    %42 = vector.broadcast %cst_18 : f32 to vector<2x8x1xf32>
    %43 = arith.addf %39, %42 : vector<2x8x1xf32>
    %44 = math.rsqrt %43 : vector<2x8x1xf32>
    %45 = vector.broadcast %44 : vector<2x8x1xf32> to vector<2x8x128xf32>
    %46 = arith.mulf %41, %45 : vector<2x8x128xf32>
    %47 = vector.shape_cast %6 : vector<1x128xf32> to vector<1x1x128xf32>
    %48 = vector.broadcast %47 : vector<1x1x128xf32> to vector<2x8x128xf32>
    %49 = arith.mulf %46, %48 : vector<2x8x128xf32>
    %50 = vector.shape_cast %7 : vector<1x128xf32> to vector<1x1x128xf32>
    %51 = vector.broadcast %50 : vector<1x1x128xf32> to vector<2x8x128xf32>
    %52 = arith.addf %49, %51 : vector<2x8x128xf32>
    %c0_19 = arith.constant 0 : index
    %c0_20 = arith.constant 0 : index
    %c0_21 = arith.constant 0 : index
    %53 = vector.load %arg6[%c0_19, %c0_20, %c0_21] : memref<2x8x128xf32, #tpu.memory_space<vmem>>, vector<2x8x128xf32>
    tpu.vector_store %arg6[%c0_19, %c0_20, %c0_21], %52 {strides = array<i32>} : memref<2x8x128xf32, #tpu.memory_space<vmem>>, vector<2x8x128xf32>,
    %54 = vector.extract_strided_slice %4 {offsets = [3, 0], sizes = [1, 128], strides = [1, 1]} : vector<8x128xf32> to vector<1x128xf32>
    %55 = vector.extract_strided_slice %4 {offsets = [4, 0], sizes = [1, 128], strides = [1, 1]} : vector<8x128xf32> to vector<1x128xf32>
    %56 = vector.extract_strided_slice %4 {offsets = [5, 0], sizes = [1, 128], strides = [1, 1]} : vector<8x128xf32> to vector<1x128xf32>
    %cst_22 = arith.constant dense<0.000000e+00> : vector<2x16x8xf32>
    %57 = tpu.matmul %3, %2, %cst_22 {dimension_numbers = #tpu.dot_dimension_numbers<[2], [2], [1], [1], [0, 0, 0, 1, 1, 1], [0], [0]>} : vector<2x16x128xbf16>, vector<2x8x128xbf16>, vector<2x16x8xf32> -> vector<2x16x8xf32>
    %cst_23 = arith.constant dense<0xFF800000> : vector<2x16xf32>
    %58 = vector.multi_reduction <maximumf>, %57, %cst_23 [2] : vector<2x16x8xf32> to vector<2x16xf32>
    %59 = vector.shape_cast %58 : vector<2x16xf32> to vector<2x16x1xf32>
    %60 = vector.broadcast %59 : vector<2x16x1xf32> to vector<2x16x8xf32>
    %61 = arith.subf %57, %60 : vector<2x16x8xf32>
    %62 = math.exp %61 : vector<2x16x8xf32>
    %cst_24 = arith.constant dense<0.000000e+00> : vector<2x16xf32>
    %63 = vector.multi_reduction <add>, %62, %cst_24 [2] : vector<2x16x8xf32> to vector<2x16xf32>
    %64 = vector.shape_cast %63 : vector<2x16xf32> to vector<2x16x1xf32>
    %65 = vector.broadcast %64 : vector<2x16x1xf32> to vector<2x16x8xf32>
    %66 = arith.divf %62, %65 : vector<2x16x8xf32>
    %67 = arith.truncf %66 : vector<2x16x8xf32> to vector<2x16x8xbf16>
    %cst_25 = arith.constant dense<0.000000e+00> : vector<2x16x128xf32>
    %68 = tpu.matmul %67, %2, %cst_25 {dimension_numbers = #tpu.dot_dimension_numbers<[2], [1], [1], [2], [0, 0, 0, 1, 1, 2], [0], [0]>} : vector<2x16x8xbf16>, vector<2x8x128xbf16>, vector<2x16x128xf32> -> vector<2x16x128xf32>
    %69 = arith.truncf %68 : vector<2x16x128xf32> to vector<2x16x128xbf16>
    %c0_26 = arith.constant 0 : index
    %c0_27 = arith.constant 0 : index
    %70 = vector.load %arg4[%c0_26, %c0_27] : memref<128x128xbf16, #tpu.memory_space<vmem>>, vector<128x128xbf16>
    %cst_28 = arith.constant dense<0.000000e+00> : vector<2x16x128xf32>
    %71 = tpu.matmul %69, %70, %cst_28 {dimension_numbers = #tpu.dot_dimension_numbers<[2], [0], [0, 1], [1], [0, 0, 0, 1, 1, 1], [], []>} : vector<2x16x128xbf16>, vector<128x128xbf16>, vector<2x16x128xf32> -> vector<2x16x128xf32>
    %72 = vector.shape_cast %54 : vector<1x128xf32> to vector<1x1x128xf32>
    %73 = vector.broadcast %72 : vector<1x1x128xf32> to vector<2x16x128xf32>
    %74 = arith.addf %71, %73 : vector<2x16x128xf32>
    %75 = arith.addf %74, %1 : vector<2x16x128xf32>
    %cst_29 = arith.constant dense<0.000000e+00> : vector<2x16xf32>
    %76 = vector.multi_reduction <add>, %75, %cst_29 [2] : vector<2x16x128xf32> to vector<2x16xf32>
    %77 = vector.shape_cast %76 : vector<2x16xf32> to vector<2x16x1xf32>
    %cst_30 = arith.constant 1.280000e+02 : f32
    %78 = vector.broadcast %cst_30 : f32 to vector<2x16x1xf32>
    %79 = arith.divf %77, %78 : vector<2x16x1xf32>
    %80 = arith.mulf %75, %75 : vector<2x16x128xf32>
    %cst_31 = arith.constant dense<0.000000e+00> : vector<2x16xf32>
    %81 = vector.multi_reduction <add>, %80, %cst_31 [2] : vector<2x16x128xf32> to vector<2x16xf32>
    %82 = vector.shape_cast %81 : vector<2x16xf32> to vector<2x16x1xf32>
    %cst_32 = arith.constant 1.280000e+02 : f32
    %83 = vector.broadcast %cst_32 : f32 to vector<2x16x1xf32>
    %84 = arith.divf %82, %83 : vector<2x16x1xf32>
    %85 = arith.mulf %79, %79 : vector<2x16x1xf32>
    %86 = arith.subf %84, %85 : vector<2x16x1xf32>
    %cst_33 = arith.constant 0.000000e+00 : f32
    %87 = vector.broadcast %cst_33 : f32 to vector<2x16x1xf32>
    %88 = arith.maximumf %86, %87 : vector<2x16x1xf32>
    %89 = vector.broadcast %79 : vector<2x16x1xf32> to vector<2x16x128xf32>
    %90 = arith.subf %75, %89 : vector<2x16x128xf32>
    %cst_34 = arith.constant 9.99999996E-13 : f32
    %91 = vector.broadcast %cst_34 : f32 to vector<2x16x1xf32>
    %92 = arith.addf %88, %91 : vector<2x16x1xf32>
    %93 = math.rsqrt %92 : vector<2x16x1xf32>
    %94 = vector.broadcast %93 : vector<2x16x1xf32> to vector<2x16x128xf32>
    %95 = arith.mulf %90, %94 : vector<2x16x128xf32>
    %96 = vector.shape_cast %55 : vector<1x128xf32> to vector<1x1x128xf32>
    %97 = vector.broadcast %96 : vector<1x1x128xf32> to vector<2x16x128xf32>
    %98 = arith.mulf %95, %97 : vector<2x16x128xf32>
    %99 = vector.shape_cast %56 : vector<1x128xf32> to vector<1x1x128xf32>
    %100 = vector.broadcast %99 : vector<1x1x128xf32> to vector<2x16x128xf32>
    %101 = arith.addf %98, %100 : vector<2x16x128xf32>
    %c0_35 = arith.constant 0 : index
    %c0_36 = arith.constant 0 : index
    %c0_37 = arith.constant 0 : index
    %102 = vector.load %arg7[%c0_35, %c0_36, %c0_37] : memref<2x16x128xf32, #tpu.memory_space<vmem>>, vector<2x16x128xf32>
    tpu.vector_store %arg7[%c0_35, %c0_36, %c0_37], %101 {strides = array<i32>} : memref<2x16x128xf32, #tpu.memory_space<vmem>>, vector<2x16x128xf32>,
    return
  }
  func.func @transform_0(%arg0: i32) -> (i32, i32, i32) {
    %c0_i32 = arith.constant 0 : i32
    %c0_i32_0 = arith.constant 0 : i32
    %c0_i32_1 = arith.constant 0 : i32
    return %arg0, %c0_i32, %c0_i32_0 : i32, i32, i32
  }
  func.func @transform_1(%arg0: i32) -> (i32, i32, i32) {
    %c0_i32 = arith.constant 0 : i32
    %c0_i32_0 = arith.constant 0 : i32
    %c0_i32_1 = arith.constant 0 : i32
    return %arg0, %c0_i32, %c0_i32_0 : i32, i32, i32
  }
  func.func @transform_2(%arg0: i32) -> (i32, i32) {
    %c0_i32 = arith.constant 0 : i32
    %c0_i32_0 = arith.constant 0 : i32
    %c0_i32_1 = arith.constant 0 : i32
    return %c0_i32, %c0_i32_0 : i32, i32
  }
  func.func @transform_3(%arg0: i32) -> (i32, i32) {
    %c0_i32 = arith.constant 0 : i32
    %c0_i32_0 = arith.constant 0 : i32
    %c0_i32_1 = arith.constant 0 : i32
    return %c0_i32, %c0_i32_0 : i32, i32
  }
  func.func @transform_4(%arg0: i32) -> (i32, i32) {
    %c0_i32 = arith.constant 0 : i32
    %c0_i32_0 = arith.constant 0 : i32
    %c0_i32_1 = arith.constant 0 : i32
    return %c0_i32, %c0_i32_0 : i32, i32
  }
  func.func @transform_5(%arg0: i32) -> (i32, i32, i32) {
    %c0_i32 = arith.constant 0 : i32
    %c0_i32_0 = arith.constant 0 : i32
    %c0_i32_1 = arith.constant 0 : i32
    return %arg0, %c0_i32, %c0_i32_0 : i32, i32, i32
  }
  func.func @transform_6(%arg0: i32) -> (i32, i32, i32) {
    %c0_i32 = arith.constant 0 : i32
    %c0_i32_0 = arith.constant 0 : i32
    %c0_i32_1 = arith.constant 0 : i32
    return %arg0, %c0_i32, %c0_i32_0 : i32, i32, i32
  }
}

</mosaic_0001>

<bundles_post_ra>
// kernel: tpu_custom_call.1
= control target key start
LH: loop header
LB: loop body
LE: loop exit
PB: predicated region body
PF: predicated region fallthrough
CT: control target
= control target key end

     0   :  { %12 = vsyncpa [#allocation3], 0  ;;  %s1548_s0 = inlined_call_operand.hbm [shape: f32[2,8,128], index: 0, kind: input, shape index: {}]   ;;  %s1549_s1 = inlined_call_operand.hbm [shape: f32[2,16,128], index: 1, kind: input, shape index: {}]   ;;  %s1550_s2 = inlined_call_operand.hbm [shape: bf16[128,128], index: 2, kind: input, shape index: {}]   ;;  %s1551_s3 = inlined_call_operand.hbm [shape: bf16[128,128], index: 3, kind: input, shape index: {}]   ;;  %s1552_s4 = inlined_call_operand.vmem [shape: f32[8,128], index: 4, kind: input, shape index: {}]   ;;  %s1553_s5 = inlined_call_operand.hbm [shape: f32[2,8,128], index: 5, kind: output, shape index: {0}]   ;;  %s1554_s6 = inlined_call_operand.hbm [shape: f32[2,16,128], index: 6, kind: output, shape index: {1}]  }
   0x1   :  { %13 = vsyncpa [#allocation6], 0 }
   0x2   :  { %14 = vsyncpa [#allocation9], 0 }
   0x3   :  { %15 = vsyncpa [#allocation4], 0 }
   0x4   :  { %16 = vsyncpa [#allocation12], 0  ;;  %s1253_s21 = smov [#allocation5]   ;;  %s1254_s23 = smov [#allocation2]  }
   0x5   :  { %s34_s22 = sshll.u32 %s1253_s21, 4  ;;  %s22_s24 = sshll.u32 %s1254_s23, 4  ;;  %s35_s22 = int_to_ptr.vmem [resolvable:$true] %s34_s22  ;;  %s1300_s24 = int_to_ptr.vmem [resolvable:$true] %s22_s24 }
   0x6   :  { %s1111_s27 = scalar_lea.hbm %s1549_s1, 512 }
   0x7   :  { %p1112_p0 = scmp.ne.s32.totalorder %s1549_s1, %s1111_s27  ;;  %p1115_p1 = scmp.lt.u32.totalorder %s1111_s27, %s1549_s1 }
   0x9   :  { %p1117_p2 = pnand %p1115_p1, %p1112_p0 }
   0xb   :  { %1120 = shalt.err (!%p1117_p2)
}
   0xc   :  { %s1121_s8 = scalar_lea.vmem %s35_s22, 512  ;;  %p1126_p4 = scmp.lt.s32.totalorder %s35_s22, %s35_s22 }
   0xd   :  { %p1122_p3 = scmp.ne.s32.totalorder %s35_s22, %s1121_s8  ;;  %p1127_p5 = scmp.lt.s32.totalorder %s1121_s8, %s1121_s8 }
   0xf   :  { %p1128_p6 = por %p1127_p5, %p1126_p4 }
  0x11   :  { %p1129_p7 = pnand %p1128_p6, %p1122_p3 }
  0x13   :  { %1132 = shalt.err (!%p1129_p7)
}
  0x14   :  { %s1255_s9 = smov 128   ;;  %s1256_s10 = smov 8  }
  0x15   :  { %40 = dma.hbm_to_vmem [thread:$0]  %s1549_s1, 512, %s35_s22, [#allocation6], %s1255_s9, %s1255_s9, %s1256_s10  }
  0x16   :  { %s1133_s15 = scalar_lea.hbm %s1548_s0, 256 }
  0x17   :  { %p1134_p8 = scmp.ne.s32.totalorder %s1548_s0, %s1133_s15  ;;  %p1137_p9 = scmp.lt.u32.totalorder %s1133_s15, %s1548_s0 }
  0x19   :  { %p1139_p10 = pnand %p1137_p9, %p1134_p8 }
  0x1b   :  { %1142 = shalt.err (!%p1139_p10)
}
  0x1c   :  { %s1143_s20 = scalar_lea.vmem %s1300_s24, 256  ;;  %p1148_p12 = scmp.lt.s32.totalorder %s1300_s24, %s1300_s24 }
  0x1d   :  { %p1144_p11 = scmp.ne.s32.totalorder %s1300_s24, %s1143_s20  ;;  %p1149_p13 = scmp.lt.s32.totalorder %s1143_s20, %s1143_s20 }
  0x1f   :  { %p1150_p0 = por %p1149_p13, %p1148_p12 }
  0x21   :  { %p1151_p1 = pnand %p1150_p0, %p1144_p11 }
  0x23   :  { %1154 = shalt.err (!%p1151_p1)
}
  0x24   :  { %28 = dma.hbm_to_vmem [thread:$0]  %s1548_s0, 256, %s1300_s24, [#allocation3], %s1255_s9, %s1255_s9, %s1256_s10  }
  0x25   :  { %s1257_s22 = smov [#allocation7]   ;;  %s1155_s27 = scalar_lea.hbm %s1550_s2, 1024 }
  0x26   :  { %s46_s23 = sshll.u32 %s1257_s22, 4  ;;  %p1156_p2 = scmp.ne.s32.totalorder %s1550_s2, %s1155_s27  ;;  %s47_s23 = int_to_ptr.vmem [resolvable:$true] %s46_s23 }
  0x27   :  { %p1159_p3 = scmp.lt.u32.totalorder %s1155_s27, %s1550_s2 }
  0x29   :  { %p1161_p4 = pnand %p1159_p3, %p1156_p2 }
  0x2b   :  { %1164 = shalt.err (!%p1161_p4)
}
  0x2c   :  { %s1165_s8 = scalar_lea.vmem %s47_s23, 1024  ;;  %p1170_p6 = scmp.lt.s32.totalorder %s47_s23, %s47_s23 }
  0x2d   :  { %p1166_p5 = scmp.ne.s32.totalorder %s47_s23, %s1165_s8  ;;  %p1171_p7 = scmp.lt.s32.totalorder %s1165_s8, %s1165_s8 }
  0x2f   :  { %p1172_p8 = por %p1171_p7, %p1170_p6 }
  0x31   :  { %p1173_p9 = pnand %p1172_p8, %p1166_p5 }
  0x33   :  { %1176 = shalt.err (!%p1173_p9)
}
  0x34   :  { %s1258_s0 = smov 64   ;;  %s1259_s24 = smov 4  }
  0x35   :  { %52 = dma.hbm_to_vmem [thread:$0]  %s1550_s2, 1024, %s47_s23, [#allocation6], %s1258_s0, %s1258_s0, %s1259_s24  }
  0x36   :  { %s1260_s13 = smov [#allocation8]   ;;  %s1177_s17 = scalar_lea.hbm %s1551_s3, 1024 }
  0x37   :  { %s58_s14 = sshll.u32 %s1260_s13, 4  ;;  %p1178_p10 = scmp.ne.s32.totalorder %s1551_s3, %s1177_s17  ;;  %s59_s14 = int_to_ptr.vmem [resolvable:$true] %s58_s14 }
  0x38   :  { %p1181_p11 = scmp.lt.u32.totalorder %s1177_s17, %s1551_s3 }
  0x3a   :  { %p1183_p12 = pnand %p1181_p11, %p1178_p10 }
  0x3c   :  { %1186 = shalt.err (!%p1183_p12)
}
  0x3d   :  { %s1187_s21 = scalar_lea.vmem %s59_s14, 1024  ;;  %p1192_p0 = scmp.lt.s32.totalorder %s59_s14, %s59_s14 }
  0x3e   :  { %p1188_p13 = scmp.ne.s32.totalorder %s59_s14, %s1187_s21  ;;  %p1193_p1 = scmp.lt.s32.totalorder %s1187_s21, %s1187_s21 }
  0x40   :  { %p1194_p2 = por %p1193_p1, %p1192_p0 }
  0x42   :  { %p1195_p3 = pnand %p1194_p2, %p1188_p13 }
  0x44   :  { %1198 = shalt.err (!%p1195_p3)
}
  0x45   :  { %64 = dma.hbm_to_vmem [thread:$0]  %s1551_s3, 1024, %s59_s14, [#allocation9], %s1258_s0, %s1258_s0, %s1259_s24  }
  0x46   :  { %1243 = dma.done.wait [#allocation3], 256  }
  0x47   :  { %1244 = vsyncadd [#allocation3], 4294967040 }
  0x48   :  { %1245 = dma.done.wait [#allocation6], 1536  }
  0x49   :  { %1246 = vsyncadd [#allocation6], 4294965760 }
  0x4a   :  { %1247 = dma.done.wait [#allocation9], 1024  }
  0x4b   :  { %1248 = vsyncadd [#allocation9], 4294966272  ;;  %v1261_v0 = vmov 0.0   ;;  %vm1262_vm0 = vmmov 0   ;;  %v1367_v1 = vld [vmem:[#allocation5] sm:$0xff]  ;;  %v1369_v2 = vld [vmem:[#allocation5 + $0x8] sm:$0xff] }
  0x4c   :  { %959 = vmatprep.subr.bf16.mxu1 %v1261_v0  ;;  %961 = vmatprep.mubr.msk.bf16.mxu1 %vm1262_vm0, %v1261_v0  ;;  %v1373_v3 = vpack.c.bf16 %v1369_v2, %v1367_v1  ;;  %v1375_v4 = vld [vmem:[#allocation2] sm:$0xff]  ;;  %v1379_v6 = vld [vmem:[#allocation5 + $0x18] sm:$0xff]  ;;  %vm171_vm1 = vcmask 130048   ;;  %v1059_v31 = vld [vmem:[#allocation7] sm:$0xff]   ;;  %vm526_vm2 = vcmask 64512   ;;  %vm576_vm3 = vcmask 1043456  }
  0x4d   :  { %983 = vmatprep.subr.bf16.mxu0 %v1261_v0  ;;  %999 = vmatprep.mubr.msk.bf16.mxu0 %vm1262_vm0, %v1261_v0  ;;  %v1377_v5 = vld [vmem:[#allocation5 + $0x10] sm:$0xff]  ;;  %v1385_v7 = vpack.c.bf16 %v1375_v4, %v1375_v4  ;;  %v1391_v9 = vld [vmem:[#allocation2 + $0x8] sm:$0xff]  ;;  %v1060_v32 = vld [vmem:[#allocation7 + $0x8] sm:$0xff]  }
  0x4e   :  { %960 = vmatpush3.bf16.xpose.msra.mxu1 %v1373_v3  ;;  %v1389_v8 = vpack.c.bf16 %v1379_v6, %v1377_v5  ;;  %v1400_v10 = vpack.c.bf16 %v1391_v9, %v1391_v9  ;;  %984 = vmatpush3.bf16.msra.mxu0 %v1059_v31  ;;  %v1061_v33 = vld [vmem:[#allocation7 + $0x10] sm:$0xff]   ;;  %v1062_v34 = vld [vmem:[#allocation7 + $0x18] sm:$0xff]   ;;  %v1063_v35 = vld [vmem:[#allocation7 + $0x20] sm:$0xff]  }
  0x4f   :  { %965 = vmatprep.subr.bf16.mxu1 %v1261_v0  ;;  %985 = vmatprep.subr.bf16.mxu0 %v1261_v0  ;;  %v1064_v44 = vld [vmem:[#allocation7 + $0x28] sm:$0xff]   ;;  %v1065_v45 = vld [vmem:[#allocation7 + $0x30] sm:$0xff]   ;;  %v1066_v46 = vld [vmem:[#allocation7 + $0x38] sm:$0xff]  }
  0x52   :  { %986 = vmatpush3.bf16.msra.mxu0 %v1060_v32 }
  0x53   :  { %987 = vmatprep.subr.bf16.mxu0 %v1261_v0 }
  0x55   :  { %962 = vmatmul.mubr.bf16.vlgmr.msra.gmra.mrb[0].mxu1 %v1385_v7 }
  0x56   :  { %966 = vmatpush3.bf16.xpose.msra.mxu1 %v1389_v8  ;;  %967 = vmatprep.mubr.msk.bf16.mxu1 %vm1262_vm0, %v1261_v0 }
  0x57   :  { %971 = vmatprep.subr.bf16.mxu1 %v1261_v0  ;;  %988 = vmatpush3.bf16.msra.mxu0 %v1061_v33  ;;  %v578_v33 = vsel %vm576_vm3, %v1385_v7, 0 }
  0x58   :  { %989 = vmatprep.subr.bf16.mxu0 %v1261_v0 }
  0x5b   :  { %990 = vmatpush3.bf16.msra.mxu0 %v1062_v34  ;;  %v300_v34 = vlaneseq }
  0x5c   :  { %991 = vmatprep.subr.bf16.mxu0 %v1261_v0 }
  0x5d   :  { %968 = vmatmul.mubr.bf16.vlgmr.msra.gmra.mrb[4].mxu1 %v1400_v10 }
  0x5e   :  { %972 = vmatpush3.bf16.msra.mxu1 %v1373_v3  ;;  %973 = vmatprep.mubr.msk.bf16.mxu1 %vm1262_vm0, %v1261_v0 }
  0x5f   :  { %977 = vmatprep.subr.bf16.mxu1 %v1261_v0  ;;  %992 = vmatpush3.bf16.msra.mxu0 %v1063_v35  ;;  %v1450_v35 = vshrl.u32 %v300_v34, 7 }
  0x60   :  { %993 = vmatprep.subr.bf16.mxu0 %v1261_v0 }
  0x63   :  { %994 = vmatpush3.bf16.msra.mxu0 %v1064_v44 }
  0x64   :  { %995 = vmatprep.subr.bf16.mxu0 %v1261_v0 }
  0x67   :  { %996 = vmatpush3.bf16.msra.mxu0 %v1065_v45 }
  0x68   :  { %997 = vmatprep.subr.bf16.mxu0 %v1261_v0 }
  0x6b   :  { %998 = vmatpush3.bf16.msra.mxu0 %v1066_v46 }
 0x128   :  { %v125_v11 = vpop.f32.mrb[0].mxu1 }
 0x129   :  { %v963_v12 = vpop.f32.mrb[1].mxu1  ;;  %v172_v13 = vsel %vm171_vm1, %v125_v11, -inf }
 0x12a   :  { %173 = vmax.xlane.f32.xlu0 %v172_v13  ;;  %v128_v14 = vpop.f32.mrb[2].mxu1 }
 0x12b   :  { %v964_v15 = vpop.f32.mrb[3].mxu1 }
 0x130   :  { %v165_v16 = vpop.f32.mrb[4].mxu1 }
 0x131   :  { %v969_v17 = vpop.f32.mrb[5].mxu1  ;;  %v175_v18 = vsel %vm171_vm1, %v165_v16, -inf }
 0x132   :  { %176 = vmax.xlane.f32.xlu0 %v175_v18  ;;  %v168_v19 = vpop.f32.mrb[6].mxu1 }
 0x133   :  { %v970_v20 = vpop.f32.mrb[7].mxu1 }
 0x1b7   :  { %v174_v21 = vpop.xlane.xlu0 %173 }
 0x1b8   :  { %v178_v22 = vsub.f32 %v125_v11, %v174_v21 }
 0x1ba   :  { %v180_v23 = vmul.f32 1.442695, %v178_v22 }
 0x1bc   :  { %1075 = vpow2.f32 %v180_v23 }
 0x1bf   :  { %v177_v24 = vpop.xlane.xlu0 %176 }
 0x1c0   :  { %v179_v25 = vsub.f32 %v165_v16, %v177_v24 }
 0x1c2   :  { %v182_v26 = vmul.f32 1.442695, %v179_v25 }
 0x1c4   :  { %1077 = vpow2.f32 %v182_v26 }
 0x1c6   :  { %v1076_v27 = vpop.eup %1075 }
 0x1c7   :  { %v184_v28 = vsel %vm171_vm1, %v1076_v27, 0.0 }
 0x1c8   :  { %185 = vadd.xlane.f32.xlu1 %v184_v28 }
 0x1ce   :  { %v1078_v29 = vpop.eup %1077 }
 0x1cf   :  { %v187_v30 = vsel %vm171_vm1, %v1078_v29, 0.0 }
 0x1d0   :  { %188 = vadd.xlane.f32.xlu1 %v187_v30 }
 0x255   :  { %v186_v36 = vpop.xlane.xlu1 %185 }
 0x256   :  { %1079 = vrcp.f32 %v186_v36  ;;  %v302_v36 = vsub.s32 0, %v1450_v35 }
 0x25d   :  { %v189_v37 = vpop.xlane.xlu1 %188 }
 0x25e   :  { %1081 = vrcp.f32 %v189_v37  ;;  %v1456_v37 = vld [vmem:[%s1552_s4] sm:$0xff]  ;;  %s1263_s4 = smov [#allocation10]  }
 0x25f   :  { %s872_s25 = sshll.u32 %s1263_s4, 4  ;;  %s873_s25 = int_to_ptr.vmem [resolvable:$true] %s872_s25 }
 0x260   :  { %v1080_v38 = vpop.eup %1079  ;;  %s1199_s26 = scalar_lea.vmem %s873_s25, 256  ;;  %p1204_p5 = scmp.lt.s32.totalorder %s873_s25, %s873_s25 }
 0x261   :  { %v191_v39 = vmul.f32 %v1080_v38, %v1076_v27  ;;  %v303_v38 = vrot.slane %v1456_v37, %v302_v36  ;;  %p1200_p4 = scmp.ne.s32.totalorder %s873_s25, %s1199_s26  ;;  %p1205_p6 = scmp.lt.s32.totalorder %s1199_s26, %s1199_s26 }
 0x263   :  { %v194_v40 = vpack.c.bf16 %v191_v39, %v191_v39  ;;  %p1206_p7 = por %p1205_p6, %p1204_p5 }
 0x265   :  { %974 = vmatmul.mubr.msk.bf16.vlgmr.msra.gmra.mrb[8].mxu1 %vm171_vm1, %v194_v40  ;;  %p1207_p8 = pnand %p1206_p7, %p1200_p4 }
 0x266   :  { %978 = vmatpush3.bf16.msra.mxu1 %v1389_v8  ;;  %979 = vmatprep.mubr.msk.bf16.mxu1 %vm1262_vm0, %v1261_v0 }
 0x267   :  { %1003 = vmatprep.subr.bf16.mxu1 %v1261_v0 }
 0x268   :  { %v1082_v41 = vpop.eup %1081 }
 0x269   :  { %v193_v42 = vmul.f32 %v1082_v41, %v1078_v29 }
 0x26b   :  { %v195_v43 = vpack.c.bf16 %v193_v42, %v193_v42 }
 0x26d   :  { %980 = vmatmul.mubr.msk.bf16.vlgmr.msra.gmra.mrb[12].mxu1 %vm171_vm1, %v195_v43 }
 0x26e   :  { %1005 = vmatprep.mubr.msk.bf16.mxu1 %vm1262_vm0, %v1261_v0 }
 0x26f   :  { %1004 = vmatpush3.bf16.xpose.msra.mxu1 %v1385_v7 }
 0x270   :  { %1009 = vmatprep.subr.bf16.mxu1 %v1261_v0 }
 0x276   :  { %1006 = vmatmul.mubr.bf16.vlgmr.msra.gmra.mrb[16].mxu1 %v1373_v3 }
 0x277   :  { %1010 = vmatpush3.bf16.xpose.msra.mxu1 %v1400_v10  ;;  %1011 = vmatprep.mubr.msk.bf16.mxu1 %vm1262_vm0, %v1261_v0 }
 0x278   :  { %1015 = vmatprep.subr.bf16.mxu1 %v1261_v0 }
 0x27e   :  { %1012 = vmatmul.mubr.bf16.vlgmr.msra.gmra.mrb[20].mxu1 %v1389_v8 }
 0x27f   :  { %1017 = vmatprep.mubr.msk.bf16.mxu1 %vm1262_vm0, %v1261_v0  ;;  %1016 = vmatpush3.bf16.msra.mxu1 %v578_v33 }
 0x280   :  { %1021 = vmatprep.subr.bf16.mxu1 %v1261_v0 }
 0x338   :  { %v233_v47 = vpop.f32.mrb[8].mxu1 }
 0x339   :  { %v975_v48 = vpop.f32.mrb[9].mxu1 }
 0x33a   :  { %v236_v49 = vpop.f32.mrb[10].mxu1  ;;  %v1067_v48 = vld [vmem:[#allocation8] sm:$0xff]  }
 0x33b   :  { %v976_v50 = vpop.f32.mrb[11].mxu1  ;;  %1027 = vmatprep.subr.bf16.mxu0 %v1067_v48  ;;  %v1069_v49 = vld [vmem:[#allocation8 + $0x10] sm:$0xff]  }
 0x33c   :  { %v1071_v50 = vld [vmem:[#allocation8 + $0x20] sm:$0xff]  }
 0x340   :  { %v276_v51 = vpop.f32.mrb[12].mxu1 }
 0x341   :  { %v923_v52 = vpack.c.bf16 %v276_v51, %v233_v47  ;;  %v981_v53 = vpop.f32.mrb[13].mxu1 }
 0x342   :  { %v279_v54 = vpop.f32.mrb[14].mxu1 }
 0x343   :  { %v982_v55 = vpop.f32.mrb[15].mxu1  ;;  %1000 = vmatmul.mubr.bf16.vlgmr.msra.gmra.mrb[0].mxu0 %v923_v52 }
 0x344   :  { %1028 = vmatpush3.bf16.msra.mxu0 %v1067_v48 }
 0x349   :  { %v478_v56 = vpop.f32.mrb[16].mxu1 }
 0x34a   :  { %v1007_v57 = vpop.f32.mrb[17].mxu1  ;;  %v527_v58 = vsel %vm526_vm2, %v478_v56, -inf }
 0x34b   :  { %528 = vmax.xlane.f32.xlu0 %v527_v58  ;;  %v481_v59 = vpop.f32.mrb[18].mxu1 }
 0x34c   :  { %v1008_v60 = vpop.f32.mrb[19].mxu1  ;;  %v530_v61 = vsel %vm526_vm2, %v481_v59, -inf }
 0x34d   :  { %531 = vmax.xlane.f32.xlu1 %v530_v61  ;;  %v625_v60 = vsel %vm576_vm3, %v1400_v10, 0 }
 0x351   :  { %v519_v62 = vpop.f32.mrb[20].mxu1 }
 0x352   :  { %v1013_v63 = vpop.f32.mrb[21].mxu1  ;;  %v533_v3 = vsel %vm526_vm2, %v519_v62, -inf }
 0x353   :  { %534 = vmax.xlane.f32.xlu0 %v533_v3  ;;  %v522_v8 = vpop.f32.mrb[22].mxu1 }
 0x354   :  { %v1014_v11 = vpop.f32.mrb[23].mxu1  ;;  %v536_v12 = vsel %vm526_vm2, %v522_v8, -inf }
 0x355   :  { %537 = vmax.xlane.f32.xlu1 %v536_v12 }
 0x3d8   :  { %v529_v13 = vpop.xlane.xlu0 %528 }
 0x3d9   :  { %v539_v14 = vsub.f32 %v478_v56, %v529_v13 }
 0x3da   :  { %v532_v15 = vpop.xlane.xlu1 %531 }
 0x3db   :  { %v543_v16 = vmul.f32 1.442695, %v539_v14  ;;  %v540_v17 = vsub.f32 %v481_v59, %v532_v15 }
 0x3dd   :  { %1083 = vpow2.f32 %v543_v16  ;;  %v545_v18 = vmul.f32 1.442695, %v540_v17 }
 0x3df   :  { %1085 = vpow2.f32 %v545_v18 }
 0x3e0   :  { %v535_v19 = vpop.xlane.xlu0 %534 }
 0x3e1   :  { %v541_v20 = vsub.f32 %v519_v62, %v535_v19 }
 0x3e2   :  { %v538_v21 = vpop.xlane.xlu1 %537 }
 0x3e3   :  { %v547_v22 = vmul.f32 1.442695, %v541_v20  ;;  %v542_v23 = vsub.f32 %v522_v8, %v538_v21 }
 0x3e5   :  { %1087 = vpow2.f32 %v547_v22  ;;  %v549_v24 = vmul.f32 1.442695, %v542_v23 }
 0x3e7   :  { %v1084_v25 = vpop.eup %1083  ;;  %1089 = vpow2.f32 %v549_v24 }
 0x3e8   :  { %v551_v26 = vsel %vm526_vm2, %v1084_v25, 0.0 }
 0x3e9   :  { %v1086_v27 = vpop.eup %1085  ;;  %552 = vadd.xlane.f32.xlu0 %v551_v26  ;;  %v438_v26 = vsub.s32 2, %v1450_v35 }
 0x3ea   :  { %v554_v28 = vsel %vm526_vm2, %v1086_v27, 0.0 }
 0x3eb   :  { %555 = vadd.xlane.f32.xlu1 %v554_v28 }
 0x3ef   :  { %v1442_v29 = vpop.eup %1087 }
 0x3f0   :  { %v557_v30 = vsel %vm526_vm2, %v1442_v29, 0.0 }
 0x3f1   :  { %v1090_v31 = vpop.eup %1089  ;;  %558 = vadd.xlane.f32.xlu0 %v557_v30 }
 0x3f2   :  { %v560_v32 = vsel %vm526_vm2, %v1090_v31, 0.0 }
 0x3f3   :  { %561 = vadd.xlane.f32.xlu1 %v560_v32  ;;  %v439_v32 = vrot.slane %v1456_v37, %v438_v26 }
 0x416   :  { %v392_v39 = vpop.f32.mrb[0].mxu0 }
 0x417   :  { %v393_v40 = vadd.f32 %v392_v39, %v303_v38  ;;  %v1001_v41 = vpop.f32.mrb[1].mxu0 }
 0x418   :  { %v395_v42 = vpop.f32.mrb[2].mxu0  ;;  %v1072_v41 = vld [vmem:[#allocation8 + $0x28] sm:$0xff]  }
 0x419   :  { %v1460_v7 = vadd.f32 %v393_v40, %v1375_v4  ;;  %v396_v43 = vadd.f32 %v395_v42, %v303_v38  ;;  %v1002_v44 = vpop.f32.mrb[3].mxu0  ;;  %v1068_v4 = vld [vmem:[#allocation8 + $0x8] sm:$0xff]   ;;  %v1073_v42 = vld [vmem:[#allocation8 + $0x30] sm:$0xff]  }
 0x41a   :  { %1029 = vmatprep.subr.bf16.mxu0 %v1068_v4 }
 0x41b   :  { %v1463_v45 = vadd.f32 %v396_v43, %v1391_v9  ;;  %401 = vadd.xlane.f32.xlu0 %v1460_v7  ;;  %v408_v46 = vmul.f32 %v1460_v7, %v1460_v7  ;;  %1030 = vmatpush3.bf16.msra.mxu0 %v1068_v4  ;;  %v1070_v9 = vld [vmem:[#allocation8 + $0x18] sm:$0xff]  }
 0x41c   :  { %1031 = vmatprep.subr.bf16.mxu0 %v1069_v49 }
 0x41d   :  { %403 = vadd.xlane.f32.xlu1 %v1463_v45  ;;  %v409_v47 = vmul.f32 %v1463_v45, %v1463_v45 }
 0x41f   :  { %410 = vadd.xlane.f32.xlu0 %v408_v46  ;;  %1032 = vmatpush3.bf16.msra.mxu0 %v1069_v49 }
 0x420   :  { %1033 = vmatprep.subr.bf16.mxu0 %v1070_v9 }
 0x421   :  { %412 = vadd.xlane.f32.xlu1 %v409_v47 }
 0x423   :  { %1034 = vmatpush3.bf16.msra.mxu0 %v1070_v9 }
 0x424   :  { %1035 = vmatprep.subr.bf16.mxu0 %v1071_v50 }
 0x427   :  { %1036 = vmatpush3.bf16.msra.mxu0 %v1071_v50 }
 0x428   :  { %1037 = vmatprep.subr.bf16.mxu0 %v1072_v41 }
 0x42b   :  { %1038 = vmatpush3.bf16.msra.mxu0 %v1072_v41 }
 0x42c   :  { %1039 = vmatprep.subr.bf16.mxu0 %v1073_v42 }
 0x42f   :  { %1040 = vmatpush3.bf16.msra.mxu0 %v1073_v42 }
 0x476   :  { %v553_v51 = vpop.xlane.xlu0 %552 }
 0x477   :  { %1091 = vrcp.f32 %v553_v51  ;;  %v688_v51 = vsub.s32 3, %v1450_v35 }
 0x478   :  { %v556_v52 = vpop.xlane.xlu1 %555 }
 0x479   :  { %1093 = vrcp.f32 %v556_v52  ;;  %v689_v52 = vrot.slane %v1456_v37, %v688_v51 }
 0x47e   :  { %v559_v53 = vpop.xlane.xlu0 %558 }
 0x47f   :  { %1095 = vrcp.f32 %v559_v53 }
 0x480   :  { %v562_v54 = vpop.xlane.xlu1 %561 }
 0x481   :  { %v1092_v55 = vpop.eup %1091  ;;  %1097 = vrcp.f32 %v562_v54 }
 0x482   :  { %v564_v57 = vmul.f32 %v1092_v55, %v1084_v25  ;;  %v432_v25 = vsub.s32 1, %v1450_v35 }
 0x483   :  { %v1094_v56 = vpop.eup %1093 }
 0x484   :  { %v566_v58 = vmul.f32 %v1094_v56, %v1086_v27  ;;  %v433_v28 = vrot.slane %v1456_v37, %v432_v25 }
 0x486   :  { %v571_v59 = vpack.c.bf16 %v566_v58, %v564_v57 }
 0x488   :  { %1018 = vmatmul.mubr.msk.bf16.vlgmr.msra.gmra.mrb[24].mxu1 %vm526_vm2, %v571_v59 }
 0x489   :  { %v1096_v61 = vpop.eup %1095  ;;  %1022 = vmatpush3.bf16.msra.mxu1 %v625_v60  ;;  %1023 = vmatprep.mubr.msk.bf16.mxu1 %vm1262_vm0, %v1261_v0 }
 0x48a   :  { %v568_v63 = vmul.f32 %v1096_v61, %v1442_v29 }
 0x48b   :  { %v1098_v62 = vpop.eup %1097 }
 0x48c   :  { %v570_v3 = vmul.f32 %v1098_v62, %v1090_v31 }
 0x48e   :  { %v572_v8 = vpack.c.bf16 %v570_v3, %v568_v63 }
 0x490   :  { %1024 = vmatmul.mubr.msk.bf16.vlgmr.msra.gmra.mrb[28].mxu1 %vm526_vm2, %v572_v8 }
 0x4a8   :  { %v402_v11 = vpop.xlane.xlu0 %401 }
 0x4a9   :  { %v406_v12 = vmul.f32 0.0078125, %v402_v11 }
 0x4aa   :  { %v404_v13 = vpop.xlane.xlu1 %403 }
 0x4ab   :  { %v407_v14 = vmul.f32 0.0078125, %v404_v13  ;;  %v416_v10 = vmul.f32 %v406_v12, %v406_v12  ;;  %v422_v27 = vsub.f32 %v1460_v7, %v406_v12  ;;  %v1074_v7 = vld [vmem:[#allocation8 + $0x38] sm:$0xff]  }
 0x4ac   :  { %v411_v15 = vpop.xlane.xlu0 %410  ;;  %1041 = vmatprep.subr.bf16.mxu0 %v1074_v7 }
 0x4ad   :  { %v414_v16 = vmul.f32 0.0078125, %v411_v15  ;;  %v417_v18 = vmul.f32 %v407_v14, %v407_v14  ;;  %v423_v30 = vsub.f32 %v1463_v45, %v407_v14  ;;  %1042 = vmatpush3.bf16.msra.mxu0 %v1074_v7 }
 0x4ae   :  { %v413_v17 = vpop.xlane.xlu1 %412 }
 0x4af   :  { %v418_v19 = vsub.f32 %v414_v16, %v416_v10  ;;  %v415_v20 = vmul.f32 0.0078125, %v413_v17 }
 0x4b1   :  { %v420_v21 = vmax.f32 %v418_v19, 0.0  ;;  %v419_v0 = vsub.f32 %v415_v20, %v417_v18 }
 0x4b3   :  { %v424_v22 = vadd.f32 1e-12, %v420_v21  ;;  %v421_v23 = vmax.f32 %v419_v0, 0.0 }
 0x4b5   :  { %1099 = vrsqrt.f32 %v424_v22  ;;  %v425_v24 = vadd.f32 1e-12, %v421_v23 }
 0x4b7   :  { %1101 = vrsqrt.f32 %v425_v24 }
 0x4bf   :  { %v1100_v29 = vpop.eup %1099 }
 0x4c0   :  { %v428_v31 = vmul.f32 %v1100_v29, %v422_v27 }
 0x4c1   :  { %v1102_v33 = vpop.eup %1101 }
 0x4c2   :  { %v429_v34 = vmul.f32 %v1102_v33, %v423_v30  ;;  %v434_v36 = vmul.f32 %v433_v28, %v428_v31 }
 0x4c4   :  { %v435_v38 = vmul.f32 %v433_v28, %v429_v34  ;;  %v440_v39 = vadd.f32 %v439_v32, %v434_v36 }
 0x4c6   :  { %v441_v40 = vadd.f32 %v439_v32, %v435_v38  ;;  %442 = vst [vmem:[#allocation10] sm:$0xff] %v440_v39 }
 0x4c8   :  { %443 = vst [vmem:[#allocation10 + $0x8] sm:$0xff] %v441_v40 }
 0x55b   :  { %v614_v43 = vpop.f32.mrb[24].mxu1 }
 0x55c   :  { %v1019_v44 = vpop.f32.mrb[25].mxu1 }
 0x55d   :  { %v617_v45 = vpop.f32.mrb[26].mxu1 }
 0x55e   :  { %v668_v46 = vpack.c.bf16 %v617_v45, %v614_v43  ;;  %v1020_v47 = vpop.f32.mrb[27].mxu1 }
 0x560   :  { %1043 = vmatprep.mubr.bf16.mxu0 %v668_v46 }
 0x563   :  { %v661_v48 = vpop.f32.mrb[28].mxu1 }
 0x564   :  { %v1025_v4 = vpop.f32.mrb[29].mxu1 }
 0x565   :  { %v664_v49 = vpop.f32.mrb[30].mxu1 }
 0x566   :  { %v669_v9 = vpack.c.bf16 %v664_v49, %v661_v48  ;;  %v1026_v50 = vpop.f32.mrb[31].mxu1 }
 0x568   :  { %1044 = vmatmul.mubr.bf16.vlgmr.msra.gmra.mrb[4].mxu0 %v669_v9 }
 0x63b   :  { %v1045_v53 = vpop.f32.mrb[4].mxu0 }
 0x63c   :  { %v781_v54 = vadd.f32 %v1045_v53, %v689_v52  ;;  %v772_v55 = vpop.f32.mrb[5].mxu0 }
 0x63d   :  { %v1046_v56 = vpop.f32.mrb[6].mxu0  ;;  %v773_v58 = vadd.f32 %v772_v55, %v689_v52 }
 0x63e   :  { %v1487_v57 = vadd.f32 %v781_v54, %v1377_v5  ;;  %v784_v59 = vadd.f32 %v1046_v56, %v689_v52  ;;  %v775_v60 = vpop.f32.mrb[7].mxu0 }
 0x63f   :  { %v776_v62 = vadd.f32 %v775_v60, %v689_v52  ;;  %v1494_v63 = vadd.f32 %v773_v58, %v1367_v1 }
 0x640   :  { %v1490_v61 = vadd.f32 %v784_v59, %v1379_v6  ;;  %795 = vadd.xlane.f32.xlu0 %v1487_v57  ;;  %v805_v1 = vmul.f32 %v1487_v57, %v1487_v57 }
 0x641   :  { %v1498_v3 = vadd.f32 %v776_v62, %v1369_v2  ;;  %v803_v5 = vmul.f32 %v1494_v63, %v1494_v63 }
 0x642   :  { %797 = vadd.xlane.f32.xlu1 %v1490_v61  ;;  %v806_v2 = vmul.f32 %v1490_v61, %v1490_v61 }
 0x643   :  { %v804_v6 = vmul.f32 %v1498_v3, %v1498_v3 }
 0x644   :  { %791 = vadd.xlane.f32.xlu0 %v1494_v63 }
 0x646   :  { %793 = vadd.xlane.f32.xlu1 %v1498_v3 }
 0x648   :  { %807 = vadd.xlane.f32.xlu0 %v803_v5 }
 0x64a   :  { %809 = vadd.xlane.f32.xlu1 %v804_v6 }
 0x64c   :  { %811 = vadd.xlane.f32.xlu0 %v805_v1 }
 0x64e   :  { %813 = vadd.xlane.f32.xlu1 %v806_v2 }
 0x64f   :  { %1210 = shalt.err (!%p1207_p8)
}
 0x650   :  { %s1211_s29 = scalar_lea.hbm %s1553_s5, 256 }
 0x651   :  { %p1212_p9 = scmp.ne.s32.totalorder %s1553_s5, %s1211_s29  ;;  %p1215_p10 = scmp.lt.u32.totalorder %s1211_s29, %s1553_s5 }
 0x653   :  { %p1217_p11 = pnand %p1215_p10, %p1212_p9 }
 0x655   :  { %1220 = shalt.err (!%p1217_p11)
}
 0x656   :  { %878 = dma.vmem_to_hbm [thread:$0]  %s873_s25, 256, %s1553_s5, [#allocation4], %s1255_s9, %s1255_s9, %s1256_s10   ;;  %v849_v42 = vsub.s32 4, %v1450_v35  ;;  %v857_v7 = vsub.s32 5, %v1450_v35 }
 0x657   :  { %s1264_s5 = smov [#allocation11]  }
 0x658   :  { %v850_v44 = vrot.slane %v1456_v37, %v849_v42  ;;  %v858_v48 = vrot.slane %v1456_v37, %v857_v7  ;;  %s884_s12 = sshll.u32 %s1264_s5, 4  ;;  %s885_s12 = int_to_ptr.vmem [resolvable:$true] %s884_s12 }
 0x659   :  { %s1221_s13 = scalar_lea.vmem %s885_s12, 512  ;;  %p1226_p13 = scmp.lt.s32.totalorder %s885_s12, %s885_s12 }
 0x65a   :  { %p1222_p12 = scmp.ne.s32.totalorder %s885_s12, %s1221_s13  ;;  %p1227_p0 = scmp.lt.s32.totalorder %s1221_s13, %s1221_s13 }
 0x65c   :  { %p1228_p1 = por %p1227_p0, %p1226_p13 }
 0x65e   :  { %p1229_p2 = pnand %p1228_p1, %p1222_p12 }
 0x6cd   :  { %v796_v8 = vpop.xlane.xlu0 %795 }
 0x6ce   :  { %v801_v16 = vmul.f32 0.0078125, %v796_v8 }
 0x6cf   :  { %v798_v11 = vpop.xlane.xlu1 %797 }
 0x6d0   :  { %v802_v19 = vmul.f32 0.0078125, %v798_v11  ;;  %v821_v24 = vmul.f32 %v801_v16, %v801_v16  ;;  %v833_v49 = vsub.f32 %v1487_v57, %v801_v16 }
 0x6d1   :  { %v792_v12 = vpop.xlane.xlu0 %791 }
 0x6d2   :  { %v799_v13 = vmul.f32 0.0078125, %v792_v12  ;;  %v822_v28 = vmul.f32 %v802_v19, %v802_v19  ;;  %v834_v52 = vsub.f32 %v1490_v61, %v802_v19 }
 0x6d3   :  { %v794_v14 = vpop.xlane.xlu1 %793 }
 0x6d4   :  { %v800_v15 = vmul.f32 0.0078125, %v794_v14  ;;  %v819_v17 = vmul.f32 %v799_v13, %v799_v13  ;;  %v831_v43 = vsub.f32 %v1494_v63, %v799_v13 }
 0x6d5   :  { %v808_v10 = vpop.xlane.xlu0 %807 }
 0x6d6   :  { %v815_v18 = vmul.f32 0.0078125, %v808_v10  ;;  %v820_v21 = vmul.f32 %v800_v15, %v800_v15  ;;  %v832_v46 = vsub.f32 %v1498_v3, %v800_v15 }
 0x6d7   :  { %v810_v20 = vpop.xlane.xlu1 %809 }
 0x6d8   :  { %v823_v0 = vsub.f32 %v815_v18, %v819_v17  ;;  %v816_v22 = vmul.f32 0.0078125, %v810_v20 }
 0x6d9   :  { %v812_v23 = vpop.xlane.xlu0 %811 }
 0x6da   :  { %v827_v25 = vmax.f32 %v823_v0, 0.0  ;;  %v824_v26 = vsub.f32 %v816_v22, %v820_v21  ;;  %v817_v27 = vmul.f32 0.0078125, %v812_v23 }
 0x6db   :  { %v814_v29 = vpop.xlane.xlu1 %813 }
 0x6dc   :  { %v835_v30 = vadd.f32 1e-12, %v827_v25  ;;  %v828_v31 = vmax.f32 %v824_v26, 0.0  ;;  %v825_v32 = vsub.f32 %v817_v27, %v821_v24  ;;  %v818_v33 = vmul.f32 0.0078125, %v814_v29 }
 0x6de   :  { %1103 = vrsqrt.f32 %v835_v30  ;;  %v836_v34 = vadd.f32 1e-12, %v828_v31  ;;  %v829_v36 = vmax.f32 %v825_v32, 0.0  ;;  %v826_v38 = vsub.f32 %v818_v33, %v822_v28 }
 0x6e0   :  { %1105 = vrsqrt.f32 %v836_v34  ;;  %v837_v39 = vadd.f32 1e-12, %v829_v36  ;;  %v830_v40 = vmax.f32 %v826_v38, 0.0 }
 0x6e2   :  { %1107 = vrsqrt.f32 %v837_v39  ;;  %v838_v41 = vadd.f32 1e-12, %v830_v40 }
 0x6e4   :  { %1109 = vrsqrt.f32 %v838_v41 }
 0x6e8   :  { %v1104_v45 = vpop.eup %1103 }
 0x6e9   :  { %v843_v47 = vmul.f32 %v1104_v45, %v831_v43 }
 0x6ea   :  { %v1106_v4 = vpop.eup %1105 }
 0x6eb   :  { %v844_v9 = vmul.f32 %v1106_v4, %v832_v46  ;;  %v851_v50 = vmul.f32 %v850_v44, %v843_v47 }
 0x6ec   :  { %v1108_v51 = vpop.eup %1107 }
 0x6ed   :  { %v845_v53 = vmul.f32 %v1108_v51, %v833_v49  ;;  %v852_v35 = vmul.f32 %v850_v44, %v844_v9  ;;  %v859_v54 = vadd.f32 %v858_v48, %v851_v50 }
 0x6ee   :  { %v1110_v55 = vpop.eup %1109 }
 0x6ef   :  { %v846_v56 = vmul.f32 %v1110_v55, %v834_v52  ;;  %v853_v58 = vmul.f32 %v850_v44, %v845_v53  ;;  %v860_v59 = vadd.f32 %v858_v48, %v852_v35  ;;  %863 = vst [vmem:[#allocation11] sm:$0xff] %v859_v54 }
 0x6f1   :  { %v854_v60 = vmul.f32 %v850_v44, %v846_v56  ;;  %v861_v37 = vadd.f32 %v858_v48, %v853_v58  ;;  %864 = vst [vmem:[#allocation11 + $0x8] sm:$0xff] %v860_v59 }
 0x6f3   :  { %v862_v62 = vadd.f32 %v858_v48, %v854_v60  ;;  %865 = vst [vmem:[#allocation11 + $0x10] sm:$0xff] %v861_v37 }
 0x6f5   :  { %866 = vst [vmem:[#allocation11 + $0x18] sm:$0xff] %v862_v62 }
 0x6f6   :  { %1232 = shalt.err (!%p1229_p2)
}
 0x6f7   :  { %s1233_s16 = scalar_lea.hbm %s1554_s6, 512 }
 0x6f8   :  { %p1234_p3 = scmp.ne.s32.totalorder %s1554_s6, %s1233_s16  ;;  %p1237_p4 = scmp.lt.u32.totalorder %s1233_s16, %s1554_s6 }
 0x6fa   :  { %p1239_p5 = pnand %p1237_p4, %p1234_p3 }
 0x6fc   :  { %1242 = shalt.err (!%p1239_p5)
}
 0x6fd   :  { %890 = dma.vmem_to_hbm [thread:$0]  %s885_s12, 512, %s1554_s6, [#allocation12], %s1255_s9, %s1255_s9, %s1256_s10  }
 0x6fe   :  { %1249 = dma.done.wait [#allocation4], 256  }
 0x6ff   :  { %1250 = vsyncadd [#allocation4], 4294967040 }
 0x700   :  { %1251 = dma.done.wait [#allocation12], 512  }
 0x701   :  { %1252 = vsyncadd [#allocation12], 4294966784 }
 0x702   :  { %897 = vsyncpa [#allocation3], 1 }
 0x703   :  { %898 = vsyncpa [#allocation6], 1 }
 0x704   :  { %899 = vsyncpa [#allocation9], 1 }
 0x705   :  { %900 = vsyncpa [#allocation4], 1 }
 0x706   :  { %901 = vsyncpa [#allocation12], 1 }

</bundles_post_ra>
